<compile_context>
chip_gen: v6e
topology: v6e:2x2x1
jax: 0.10.0
libtpu: 0.0.40
codegen_flags: <defaults>
</compile_context>

<pallas_src>
import functools

import jax
import jax.numpy as jnp
from jax.experimental import pallas as pl
from jax.experimental.pallas import tpu as pltpu

LN_EPS = 1e-5  # nn.LayerNorm default


def _round_up(x, m):
    return ((x + m - 1) // m) * m


def _vmem_capacity_bytes():
    """Per-TensorCore VMEM capacity (128 MiB on v5e/v6e, 64 MiB on v7x)."""
    try:
        info = pltpu.get_tpu_info()
        cap = getattr(info, "vmem_capacity_bytes", None)
        if cap:
            return int(cap)
    except Exception:
        pass
    return 64 * 1024 * 1024  # conservative fallback (v7x per-TC)


def _prenorm_kernel(x_ref, gamma_ref, beta_ref, w_ref, bias_ref, o_ref, xn_ref):
    # x_ref:     (tm, D)     row tile (input dtype)
    # gamma_ref: (1, D)      LayerNorm weight (pre-cast f32)
    # beta_ref:  (1, D)      LayerNorm bias   (pre-cast f32)
    # w_ref:     (D, tn)     Linear weight tile (pre-cast to MXU dtype)
    # bias_ref:  (1, tn)     Linear bias tile (pre-cast f32)
    # o_ref:     (tm, tn)    output tile
    # xn_ref:    (tm, D)     VMEM scratch: normalized rows, cached across N tiles
    #
    # Grid = (row_tiles, col_tiles); axis 1 is innermost and sequential ("arbitrary"),
    # so LayerNorm for a row tile is computed once (j == 0) and reused for every
    # output-column tile via xn_ref. Do NOT mark axis 1 "parallel" or reorder the grid.
    @pl.when(pl.program_id(1) == 0)
    def _():
        x = x_ref[...].astype(jnp.float32)
        mean = jnp.mean(x, axis=-1, keepdims=True)
        centered = x - mean
        var = jnp.mean(centered * centered, axis=-1, keepdims=True)
        xn = centered * jax.lax.rsqrt(var + LN_EPS)
        xn = xn * gamma_ref[...] + beta_ref[...]
        xn_ref[...] = xn.astype(xn_ref.dtype)

    # fn: Linear on the normalized tokens. Operands already in the MXU dtype
    # (pre-cast in the wrapper); accumulation in f32.
    y = jnp.dot(xn_ref[...], w_ref[...], preferred_element_type=jnp.float32)
    o_ref[...] = (y + bias_ref[...]).astype(o_ref.dtype)


@functools.partial(jax.jit,
                   static_argnames=("tm", "tn", "mxu_bf16", "force_w_tiled"))
def prenorm_forward(x, gamma, beta, w, bias, *, tm=1024, tn=512,
                    mxu_bf16=False, force_w_tiled=False):
    """y = Linear(LayerNorm(x)); x: (B, S, D) -> y: (B, S, Dout).

    mxu_bf16:      opt-in bf16 MXU operands for f32 inputs (LN stats / accum stay f32).
    force_w_tiled: debug knob to force the tiled-weight (multi column-step) path.
    """
    B, S, D = x.shape
    Dout = w.shape[1]
    n = B * S

    # MXU operand dtype: bf16 inputs stay bf16; f32 inputs may opt into bf16 operands.
    mm_dtype = jnp.bfloat16 if (mxu_bf16 or x.dtype == jnp.bfloat16) else jnp.float32
    xb = jnp.dtype(x.dtype).itemsize
    ob = xb                                   # output dtype == input dtype
    mmb = jnp.dtype(mm_dtype).itemsize

    # --- generation-aware VMEM budgets ---
    vmem_cap = _vmem_capacity_bytes()
    # Keep the scoped limit well below physical (compiler scratch / semaphores headroom);
    # on v7x (64 MiB) this lands ~52 MiB, on v5e/v6e (128 MiB) ~109 MiB.
    vmem_limit_cap = min(vmem_cap - 12 * 1024 * 1024, int(0.85 * vmem_cap))
    budget = int(0.75 * vmem_limit_cap)       # tile-footprint budget

    # --- output (lane) tiling ---
    Dout_p = _round_up(Dout, 128)
    # Pallas allocates 2 buffers per input even when the block index is constant.
    resident_bytes = 2 * D * Dout_p * mmb
    w_resident = (not force_w_tiled) and (resident_bytes <= budget // 2)
    if w_resident:
        # Whole weight resident: single column step, W DMA'd from HBM exactly once.
        tn_ = Dout_p
    else:
        # Largest multiple-of-128 divisor of Dout_p that is <= requested tn:
        # Dout is only padded to 128, never to tn (no dead MXU / DMA columns).
        req = max(128, min(_round_up(tn, 128), Dout_p))
        tn_ = 128
        cand = 128
        while cand <= req:
            if Dout_p % cand == 0:
                tn_ = cand
            cand += 128
        # TODO(synk): optional pl.Buffered(3) on the W BlockSpec to deepen the W DMA
        # pipeline when there are many column steps (left at the default depth here).

    def _footprint(tm_):
        return (2 * tm_ * D * xb              # double-buffered x tiles
                + tm_ * D * mmb               # xn scratch
                + 2 * tm_ * tn_ * ob          # double-buffered output tiles
                + 2 * D * tn_ * mmb           # W buffers
                + 2 * (2 * D + tn_) * 4)      # gamma / beta / bias (f32)

    # --- row tiling: multiple of 8, as large as the VMEM budget allows ---
    tm_ = min(tm, _round_up(n, 8))
    tm_ = max(8, (tm_ // 8) * 8)
    while tm_ > 8 and _footprint(tm_) > budget:
        tm_ = max(8, (tm_ // 2 // 8) * 8)
    n_p = _round_up(n, tm_)
    # Keep both v7x TensorCores busy: at least 2 row tiles on the "parallel" axis.
    while n > 8 and tm_ > 8 and n_p // tm_ < 2:
        tm_ = max(8, (tm_ // 2 // 8) * 8)
        n_p = _round_up(n, tm_)

    # --- pad rows / output columns so tiles divide evenly (sliced off after) ---
    x2 = x.reshape(n, D)
    if n_p != n:
        x2 = jnp.pad(x2, ((0, n_p - n), (0, 0)))
    w_p = w if Dout_p == Dout else jnp.pad(w, ((0, 0), (0, Dout_p - Dout)))
    bias_p = bias if Dout_p == Dout else jnp.pad(bias, ((0, Dout_p - Dout),))

    # Pre-cast once in the wrapper: no per-grid-step casts inside the kernel, and W is
    # streamed from HBM in the MXU dtype (half the bytes for bf16).
    w_p = w_p.astype(mm_dtype)
    gamma2 = gamma.reshape(1, D).astype(jnp.float32)
    beta2 = beta.reshape(1, D).astype(jnp.float32)
    bias2 = bias_p.reshape(1, Dout_p).astype(jnp.float32)

    vmem_limit = int(min(vmem_limit_cap,
                         max(32 * 1024 * 1024, 2 * _footprint(tm_))))

    out2 = pl.pallas_call(
        _prenorm_kernel,
        out_shape=jax.ShapeDtypeStruct((n_p, Dout_p), x.dtype),
        grid_spec=pltpu.PrefetchScalarGridSpec(
            num_scalar_prefetch=0,
            grid=(n_p // tm_, Dout_p // tn_),
            in_specs=[
                pl.BlockSpec((tm_, D), lambda i, j: (i, 0)),   # x rows (constant in j)
                pl.BlockSpec((1, D), lambda i, j: (0, 0)),     # gamma (replicated)
                pl.BlockSpec((1, D), lambda i, j: (0, 0)),     # beta
                pl.BlockSpec((D, tn_), lambda i, j: (0, j)),   # W column tile / resident
                pl.BlockSpec((1, tn_), lambda i, j: (0, j)),   # bias tile
            ],
            out_specs=pl.BlockSpec((tm_, tn_), lambda i, j: (i, j)),
            scratch_shapes=[pltpu.VMEM((tm_, D), mm_dtype)],   # cached normalized rows
        ),
        compiler_params=pltpu.CompilerParams(
            dimension_semantics=("parallel", "arbitrary"),
            vmem_limit_bytes=vmem_limit),
    )(x2, gamma2, beta2, w_p, bias2)

    return out2[:n, :Dout].reshape(B, S, Dout)


def prenorm_reference(x, gamma, beta, w, bias):
    xf = x.astype(jnp.float32)
    mean = jnp.mean(xf, axis=-1, keepdims=True)
    var = jnp.mean((xf - mean) ** 2, axis=-1, keepdims=True)
    xn = (xf - mean) * jax.lax.rsqrt(var + LN_EPS)
    xn = xn * gamma.astype(jnp.float32) + beta.astype(jnp.float32)
    y = jnp.dot(xn, w.astype(jnp.float32),
                precision=jax.lax.Precision.HIGHEST) + bias.astype(jnp.float32)
    return y.astype(x.dtype)


def _make_params(key, D, Dout, dtype):
    k1, k2, k3, k4, k5 = jax.random.split(key, 5)
    gamma = (1.0 + 0.1 * jax.random.normal(k2, (D,), jnp.float32)).astype(dtype)
    beta = (0.1 * jax.random.normal(k3, (D,), jnp.float32)).astype(dtype)
    w = (0.02 * jax.random.normal(k4, (D, Dout), jnp.float32)).astype(dtype)
    bias = (0.02 * jax.random.normal(k5, (Dout,), jnp.float32)).astype(dtype)
    return k1, gamma, beta, w, bias


if __name__ == "__main__":
    key = jax.random.PRNGKey(0)

    # Case 1: lane-aligned ViT-ish shapes, f32, weight-resident path.
    B, S, D, Dout = 2, 8, 128, 128
    kx, gamma, beta, w, bias = _make_params(key, D, Dout, jnp.float32)
    x = jax.random.normal(kx, (B, S, D), jnp.float32)
    y = jax.block_until_ready(prenorm_forward(x, gamma, beta, w, bias))
    y_ref = prenorm_reference(x, gamma, beta, w, bias)
    assert y.shape == (B, S, Dout)
    assert jnp.allclose(y, y_ref, atol=1e-3, rtol=1e-3), "case1 mismatch"

    # Case 2: ragged shapes (row count and Dout not tile multiples -> padding path).
    B, S, D, Dout = 2, 7, 96, 192
    kx, gamma, beta, w, bias = _make_params(jax.random.PRNGKey(1), D, Dout, jnp.float32)
    x = jax.random.normal(kx, (B, S, D), jnp.float32)
    y = jax.block_until_ready(prenorm_forward(x, gamma, beta, w, bias))
    y_ref = prenorm_reference(x, gamma, beta, w, bias)
    assert y.shape == (B, S, Dout)
    assert jnp.allclose(y, y_ref, atol=1e-3, rtol=1e-3), "case2 mismatch"

    # Case 3: bf16 inputs -> bf16 MXU operands (LN stats still in f32).
    B, S, D, Dout = 2, 8, 128, 256
    kx, gamma, beta, w, bias = _make_params(jax.random.PRNGKey(2), D, Dout, jnp.bfloat16)
    x = jax.random.normal(kx, (B, S, D), jnp.float32).astype(jnp.bfloat16)
    y = jax.block_until_ready(prenorm_forward(x, gamma, beta, w, bias))
    y_ref = prenorm_reference(x, gamma, beta, w, bias)
    assert y.shape == (B, S, Dout)
    assert jnp.allclose(y.astype(jnp.float32), y_ref.astype(jnp.float32),
                        atol=5e-2, rtol=5e-2), "case3 mismatch"

    # Case 4: forced tiled-weight path (multiple column steps) -> exercises the
    # LN-cache-across-N-tiles logic (pl.when on program_id(1) == 0).
    B, S, D, Dout = 2, 12, 64, 384
    kx, gamma, beta, w, bias = _make_params(jax.random.PRNGKey(3), D, Dout, jnp.float32)
    x = jax.random.normal(kx, (B, S, D), jnp.float32)
    y = jax.block_until_ready(
        prenorm_forward(x, gamma, beta, w, bias, tn=128, force_w_tiled=True))
    y_ref = prenorm_reference(x, gamma, beta, w, bias)
    assert y.shape == (B, S, Dout)
    assert jnp.allclose(y, y_ref, atol=1e-3, rtol=1e-3), "case4 mismatch"

    # Case 5: opt-in bf16 MXU operands for f32 inputs.
    B, S, D, Dout = 2, 8, 128, 128
    kx, gamma, beta, w, bias = _make_params(jax.random.PRNGKey(4), D, Dout, jnp.float32)
    x = jax.random.normal(kx, (B, S, D), jnp.float32)
    y = jax.block_until_ready(prenorm_forward(x, gamma, beta, w, bias, mxu_bf16=True))
    y_ref = prenorm_reference(x, gamma, beta, w, bias)
    assert y.shape == (B, S, Dout)
    assert jnp.allclose(y, y_ref, atol=5e-2, rtol=5e-2), "case5 mismatch"

    print("KERNEL_OK")
</pallas_src>

<mosaic_0001>
module attributes {stable_mosaic.version = 11 : i64} {
  func.func @_prenorm_kernel(%arg0: i32, %arg1: i32, %arg2: memref<8x128xf32, #tpu.memory_space<vmem>>, %arg3: memref<1x128xf32, #tpu.memory_space<vmem>>, %arg4: memref<1x128xf32, #tpu.memory_space<vmem>>, %arg5: memref<128x128xf32, #tpu.memory_space<vmem>>, %arg6: memref<1x128xf32, #tpu.memory_space<vmem>>, %arg7: memref<8x128xf32, #tpu.memory_space<vmem>>, %arg8: memref<8x128xf32, #tpu.memory_space<vmem>>) attributes {dimension_semantics = [#tpu.dimension_semantics<parallel>, #tpu.dimension_semantics<arbitrary>], iteration_bounds = array<i64: 2, 1>, scalar_prefetch = 0 : i64, scratch_operands = 1 : i64, tpu.core_type = #tpu.core_type<tc>, window_params = [{transform_indices = @transform_0, window_bounds = array<i64: 8, 128>}, {pipeline_mode = #tpu.pipeline_mode<synchronous>, transform_indices = @transform_1, window_bounds = array<i64: 1, 128>}, {pipeline_mode = #tpu.pipeline_mode<synchronous>, transform_indices = @transform_2, window_bounds = array<i64: 1, 128>}, {transform_indices = @transform_3, window_bounds = array<i64: 128, 128>}, {transform_indices = @transform_4, window_bounds = array<i64: 1, 128>}, {transform_indices = @transform_5, window_bounds = array<i64: 8, 128>}]} {
    %c0_i32 = arith.constant 0 : i32
    %0 = arith.cmpi eq, %arg1, %c0_i32 : i32
    %1 = arith.extui %0 : i1 to i32
    %c0_i32_0 = arith.constant 0 : i32
    %2 = arith.cmpi ne, %1, %c0_i32_0 : i32
    scf.if %2 {
      %c0_8 = arith.constant 0 : index
      %c0_9 = arith.constant 0 : index
      %10 = vector.load %arg2[%c0_8, %c0_9] : memref<8x128xf32, #tpu.memory_space<vmem>>, vector<8x128xf32>
      %cst_10 = arith.constant dense<0.000000e+00> : vector<8xf32>
      %11 = vector.multi_reduction <add>, %10, %cst_10 [1] : vector<8x128xf32> to vector<8xf32>
      %12 = vector.shape_cast %11 : vector<8xf32> to vector<8x1xf32>
      %cst_11 = arith.constant 1.280000e+02 : f32
      %13 = vector.broadcast %cst_11 : f32 to vector<8x1xf32>
      %14 = arith.divf %12, %13 : vector<8x1xf32>
      %15 = vector.broadcast %14 : vector<8x1xf32> to vector<8x128xf32>
      %16 = arith.subf %10, %15 : vector<8x128xf32>
      %17 = arith.mulf %16, %16 : vector<8x128xf32>
      %cst_12 = arith.constant dense<0.000000e+00> : vector<8xf32>
      %18 = vector.multi_reduction <add>, %17, %cst_12 [1] : vector<8x128xf32> to vector<8xf32>
      %19 = vector.shape_cast %18 : vector<8xf32> to vector<8x1xf32>
      %cst_13 = arith.constant 1.280000e+02 : f32
      %20 = vector.broadcast %cst_13 : f32 to vector<8x1xf32>
      %21 = arith.divf %19, %20 : vector<8x1xf32>
      %cst_14 = arith.constant 9.99999974E-6 : f32
      %22 = vector.broadcast %cst_14 : f32 to vector<8x1xf32>
      %23 = arith.addf %21, %22 : vector<8x1xf32>
      %24 = math.rsqrt %23 : vector<8x1xf32>
      %25 = vector.broadcast %24 : vector<8x1xf32> to vector<8x128xf32>
      %26 = arith.mulf %16, %25 : vector<8x128xf32>
      %c0_15 = arith.constant 0 : index
      %c0_16 = arith.constant 0 : index
      %27 = vector.load %arg3[%c0_15, %c0_16] : memref<1x128xf32, #tpu.memory_space<vmem>>, vector<1x128xf32>
      %28 = vector.broadcast %27 : vector<1x128xf32> to vector<8x128xf32>
      %29 = arith.mulf %26, %28 : vector<8x128xf32>
      %c0_17 = arith.constant 0 : index
      %c0_18 = arith.constant 0 : index
      %30 = vector.load %arg4[%c0_17, %c0_18] : memref<1x128xf32, #tpu.memory_space<vmem>>, vector<1x128xf32>
      %31 = vector.broadcast %30 : vector<1x128xf32> to vector<8x128xf32>
      %32 = arith.addf %29, %31 : vector<8x128xf32>
      %c0_19 = arith.constant 0 : index
      %c0_20 = arith.constant 0 : index
      %33 = vector.load %arg8[%c0_19, %c0_20] : memref<8x128xf32, #tpu.memory_space<vmem>>, vector<8x128xf32>
      tpu.vector_store %arg8[%c0_19, %c0_20], %32 {strides = array<i32>} : memref<8x128xf32, #tpu.memory_space<vmem>>, vector<8x128xf32>,
    } else {
    }
    %c0 = arith.constant 0 : index
    %c0_1 = arith.constant 0 : index
    %3 = vector.load %arg8[%c0, %c0_1] : memref<8x128xf32, #tpu.memory_space<vmem>>, vector<8x128xf32>
    %c0_2 = arith.constant 0 : index
    %c0_3 = arith.constant 0 : index
    %4 = vector.load %arg5[%c0_2, %c0_3] : memref<128x128xf32, #tpu.memory_space<vmem>>, vector<128x128xf32>
    %cst = arith.constant dense<0.000000e+00> : vector<8x128xf32>
    %5 = tpu.matmul %3, %4, %cst {dimension_numbers = #tpu.dot_dimension_numbers<[1], [0], [0], [1], [0, 0, 1, 1], [], []>} : vector<8x128xf32>, vector<128x128xf32>, vector<8x128xf32> -> vector<8x128xf32>
    %c0_4 = arith.constant 0 : index
    %c0_5 = arith.constant 0 : index
    %6 = vector.load %arg6[%c0_4, %c0_5] : memref<1x128xf32, #tpu.memory_space<vmem>>, vector<1x128xf32>
    %7 = vector.broadcast %6 : vector<1x128xf32> to vector<8x128xf32>
    %8 = arith.addf %5, %7 : vector<8x128xf32>
    %c0_6 = arith.constant 0 : index
    %c0_7 = arith.constant 0 : index
    %9 = vector.load %arg7[%c0_6, %c0_7] : memref<8x128xf32, #tpu.memory_space<vmem>>, vector<8x128xf32>
    tpu.vector_store %arg7[%c0_6, %c0_7], %8 {strides = array<i32>} : memref<8x128xf32, #tpu.memory_space<vmem>>, vector<8x128xf32>,
    return
  }
  func.func @transform_0(%arg0: i32, %arg1: i32) -> (i32, i32) {
    %c0_i32 = arith.constant 0 : i32
    %c0_i32_0 = arith.constant 0 : i32
    return %arg0, %c0_i32 : i32, i32
  }
  func.func @transform_1(%arg0: i32, %arg1: i32) -> (i32, i32) {
    %c0_i32 = arith.constant 0 : i32
    %c0_i32_0 = arith.constant 0 : i32
    %c0_i32_1 = arith.constant 0 : i32
    return %c0_i32, %c0_i32_0 : i32, i32
  }
  func.func @transform_2(%arg0: i32, %arg1: i32) -> (i32, i32) {
    %c0_i32 = arith.constant 0 : i32
    %c0_i32_0 = arith.constant 0 : i32
    %c0_i32_1 = arith.constant 0 : i32
    return %c0_i32, %c0_i32_0 : i32, i32
  }
  func.func @transform_3(%arg0: i32, %arg1: i32) -> (i32, i32) {
    %c0_i32 = arith.constant 0 : i32
    %c0_i32_0 = arith.constant 0 : i32
    return %c0_i32, %arg1 : i32, i32
  }
  func.func @transform_4(%arg0: i32, %arg1: i32) -> (i32, i32) {
    %c0_i32 = arith.constant 0 : i32
    %c0_i32_0 = arith.constant 0 : i32
    return %c0_i32, %arg1 : i32, i32
  }
  func.func @transform_5(%arg0: i32, %arg1: i32) -> (i32, i32) {
    %c0_i32 = arith.constant 0 : i32
    return %arg0, %arg1 : i32, i32
  }
}

</mosaic_0001>

<bundles_post_ra>
// kernel: prenorm_forward.1
= control target key start
LH: loop header
LB: loop body
LE: loop exit
PB: predicated region body
PF: predicated region fallthrough
CT: control target
= control target key end

     0   :  { %s1050_s0 = inlined_call_operand.hbm [shape: f32[16,128], index: 0, kind: input, shape index: {}]   ;;  %s1051_s1 = inlined_call_operand.vmem [shape: f32[1,128], index: 1, kind: input, shape index: {}]   ;;  %s1052_s2 = inlined_call_operand.vmem [shape: f32[1,128], index: 2, kind: input, shape index: {}]   ;;  %s1053_s3 = inlined_call_operand.hbm [shape: f32[128,128], index: 3, kind: input, shape index: {}]   ;;  %s1054_s4 = inlined_call_operand.vmem [shape: f32[1,128], index: 4, kind: input, shape index: {}]   ;;  %s1055_s5 = inlined_call_operand.hbm [shape: f32[16,128], index: 5, kind: output, shape index: {}]  }
   0x1   :  { %1058 = sst [smem:[#allocation13_spill]] %s1053_s3 }
   0x2   :  { %10 = vsyncpa [#allocation4], 0 }
   0x3   :  { %12 = vsyncpa [#allocation4 + $0x1], 0 }
   0x4   :  { %13 = vsyncpa [#allocation7], 0 }
   0x5   :  { %14 = vsyncpa [#allocation5], 0 }
   0x6   :  { %16 = vsyncpa [#allocation5 + $0x1], 0  ;;  %s864_s18 = smov 0   ;;  %s866_s19 = smov 0  }
   0x7   :  { %s868_s20 = smov 0   ;;  %s870_s21 = smov 0  }
   0x8   :  { %s872_s22 = smov 0   ;;  %s874_s23 = smov 0  }
   0x9 LB: > { %s537_s24 = sadd.s32 4294967295, %s825_s23   ;;  %s538_s25 = sadd.s32 4294967294, %s825_s23   ;;  %s825_s23 = sphi %s874_s23, %s22_s23   ;;  %s821_s22 = sphi %s872_s22, %s1078_s22   ;;  %s817_s21 = sphi %s870_s21, %s1077_s21   ;;  %s813_s20 = sphi %s868_s20, %s1076_s20   ;;  %s809_s19 = sphi %s866_s19, %s1075_s19   ;;  %s805_s18 = sphi %s864_s18, %s1074_s18  }
   0xa   : > { %p54_p0 = scmp.ne.s32.totalorder %s809_s19, %s805_s18  ;;  %p898_p1 = scmp.eq.s32.totalorder %s537_s24, 0 }
   0xb   : > { %p902_p2 = scmp.eq.s32.totalorder %s537_s24, 1  ;;  %p180_p3 = scmp.eq.s32.totalorder %s538_s25, 1 }
   0xc   : > { %p908_p4 = por %p898_p1, %p54_p0  ;;  %p539_p5 = scmp.ge.s32.totalorder %s825_s23, 1 }
   0xd   : > { %p913_p6 = por %p180_p3, %p54_p0  ;;  %p187_p7 = scmp.lt.s32.totalorder %s825_s23, 3 }
   0xe   : > { %s1061_s28 = scalar_select %p908_p4, 1, 0 }
   0xf   : > { %s1062_s29 = scalar_select %p913_p6, 1, 0 }
  0x10   : > { %p918_p8 = pnand %p539_p5, %p187_p7  ;;  %s827_s6 = smov [#allocation6]  }
  0x11   : > { %s207_s7 = sshll.u32 %s827_s6, 4  ;;  %s34_s9 = sadd.s32 1, %s821_s22  ;;  %s208_s7 = int_to_ptr.vmem [resolvable:$true] %s207_s7 }
  0x12   : > { %p616_p9 = pneg %p918_p8  ;;  %s698_s10 = scalar_lea.vmem %s208_s7, 2048 }
  0x13   : > { %p699_p13 = scmp.ne.s32.totalorder %s208_s7, %s698_s10  ;;  %p706_p5 = scmp.lt.s32.totalorder %s208_s7, %s208_s7 }
  0x14   : > { %p927_p11 = pnand %p616_p9, %p898_p1  ;;  %p707_p7 = scmp.lt.s32.totalorder %s698_s10, %s698_s10 }
  0x16   : > { %p689_p12 = pneg %p927_p11  ;;  %p708_p6 = por %p707_p7, %p706_p5 }
  0x18   : > { %p701_p0 = pnand %p699_p13, %p689_p12 }
  0x1a   : > { %p702_p3 = pneg %p701_p0 }
  0x1c   : > { %p709_p4 = pnand %p708_p6, %p702_p3 }
  0x1e   : > { %712 = shalt.err (!%p709_p4)
}
  0x1f   : > { %s828_s11 = smov 128   ;;  %s829_s12 = smov 8  }
  0x20   : > { %s1065_s3 = sld [smem:[#allocation13_spill]]  ;;  %p36_p6 = scmp.ge.s32.totalorder %s34_s9, 2 }
  0x21   : > { %s41_s15 = sadd.s32 1, %s813_s20  ;;  %p48_p4 = scmp.ne.s32.totalorder %s813_s20, %s809_s19 }
  0x22   : > { %p49_p9 = scmp.eq.s32.totalorder %s825_s23, 0  ;;  %s1080_s9 = smov (%p36_p6, %s34_s9), 0 }
  0x23   : > { %1066 = sst [smem:[#allocation12_spill]] %s1080_s9  ;;  %p951_p13 = por %p902_p2, %p48_p4 }
  0x24   : > { %p945_p12 = por %p49_p9, %p48_p4  ;;  %s38_s24 = ssub.s32 %s821_s22, %s1080_s9 }
  0x25   : > { %p629_p0 = scmp.lt.s32.totalorder %s825_s23, 2  ;;  %s227_s25 = sand.u32 1, %s813_s20  }
  0x26   : > { %619 = dma.hbm_to_vmem [thread:$0]  (!%p927_p11), %s1065_s3, 2048, %s208_s7, [#allocation7], %s828_s11, %s828_s11, %s829_s12  }
  0x27   : > { %p39_p11 = scmp.eq.s32.totalorder %s38_s24, 0  ;;  %s543_s6 = sshll.u32 %s227_s25, 3 }
  0x28   : > { %s544_s8 = sshll.u32 %s821_s22, 7  ;;  %s231_s13 = scalar_lea.vmem [#allocation3], %s543_s6 }
  0x29   : > { %s960_s7 = scalar_select %p39_p11, %s813_s20, %s41_s15  }
  0x2a   : > { %s236_s12 = scalar_lea.hbm %s1050_s0, %s544_s8  ;;  %s238_s14 = sshll.u32 %s231_s13, 4  ;;  %s239_s14 = int_to_ptr.vmem [resolvable:$true] %s238_s14 }
  0x2b   : > { %p968_p2 = pnand %p629_p0, %p945_p12  ;;  %s228_s3 = scalar_lea.sflag [#allocation4], %s227_s25 }
  0x2c   : > { %s726_s24 = scalar_lea.vmem %s239_s14, 128  ;;  %s830_s15 = smov [#allocation3]  }
  0x2d   : > { %p715_p3 = pneg %p968_p2  ;;  %p727_p5 = scmp.ne.s32.totalorder %s239_s14, %s726_s24 }
  0x2e   : > { %s731_s9 = sshll.u32 %s830_s15, 4  ;;  %s732_s9 = int_to_ptr.vmem [resolvable:$false] %s731_s9 }
  0x2f   : > { %p729_p7 = pnand %p727_p5, %p715_p3  ;;  %s733_s8 = scalar_lea.vmem %s732_s9, 256 }
  0x30   : > { %p734_p4 = scmp.lt.s32.totalorder %s239_s14, %s732_s9  ;;  %p735_p9 = scmp.lt.s32.totalorder %s733_s8, %s726_s24 }
  0x31   : > { %p730_p6 = pneg %p729_p7 }
  0x32   : > { %p736_p11 = por %p735_p9, %p734_p4 }
  0x34   : > { %p737_p10 = pnand %p736_p11, %p730_p6 }
  0x36   : > { %740 = shalt.err (!%p737_p10)
}
  0x37   : > { %623 = dma.hbm_to_vmem [thread:$0]  (!%p968_p2), %s236_s12, 128, %s239_s14, %s228_s3  }
  0x38   : > { %247 = sbr.rel (%p918_p8) target bundleno = 579 (0x243), region = 40  ;;  %s979_s16 = sand.u32 (!%p918_p8), 1, %s809_s19  }
  0x39   : > { %s546_s25 = sshll.u32 (!%p918_p8), %s979_s16, 3  ;;  %s250_s6 = scalar_lea.sflag (!%p918_p8), [#allocation4], %s979_s16 }
  0x3a   : > { %s253_s9 = scalar_lea.vmem (!%p918_p8), [#allocation3], %s546_s25  ;;  %p1070_p12 = scmp.ne.s32.totalorder (!%p918_p8), %s1061_s28, 0 }
  0x3d   : > { %792 = dma.done.wait (%p1070_p12), %s250_s6, 128  }
  0x3e   : > { %794 = vsyncadd (%p1070_p12), %s250_s6, 4294967168 }
  0x3f   : > { %796 = dma.done.wait (%p898_p1), [#allocation7], 2048  }
  0x40   : > { %798 = vsyncadd (%p898_p1), [#allocation7], 4294965248  ;;  %v294_v0 = vld [vmem:[%s253_s9] sm:$0xff]  ;;  %v831_v2 = vmov 0.0   ;;  %v338_v4 = vld [vmem:[#allocation6 + $0x68] sm:$0xff]  ;;  %vm832_vm0 = vmmov 0  }
  0x41   : > { %295 = vadd.xlane.f32.xlu0 %v294_v0  ;;  %v340_v1 = vld [vmem:[#allocation6 + $0x78] sm:$0xff]  ;;  %573 = vmatprep.subr.mxu0 %v831_v2  ;;  %v339_v3 = vld [vmem:[#allocation6 + $0x70] sm:$0xff]  ;;  %v337_v5 = vld [vmem:[#allocation6 + $0x60] sm:$0xff]  ;;  %s553_s12 = sshll.u32 %s817_s21, 7  ;;  %s286_s13 = scalar_lea.vmem [#allocation8], %s546_s25 }
  0x42   : > { %574 = vmatpush3.msra.mxu0 %v340_v1  ;;  %v336_v10 = vld [vmem:[#allocation6 + $0x58] sm:$0xff]  ;;  %v335_v11 = vld [vmem:[#allocation6 + $0x50] sm:$0xff]  ;;  %v334_v12 = vld [vmem:[#allocation6 + $0x48] sm:$0xff]  ;;  %605 = vmatprep.mubr.msk.f32.mxu0 %vm832_vm0, %v831_v2  ;;  %s434_s14 = sshll.u32 %s286_s13, 4  ;;  %s1008_s15 = scalar_lea.hbm %s1055_s5, %s553_s12  ;;  %s435_s14 = int_to_ptr.vmem [resolvable:$true] %s434_s14 }
  0x43   : > { %575 = vmatprep.subr.mxu0 %v831_v2  ;;  %v333_v13 = vld [vmem:[#allocation6 + $0x40] sm:$0xff]  ;;  %v332_v14 = vld [vmem:[#allocation6 + $0x38] sm:$0xff]  ;;  %v331_v15 = vld [vmem:[#allocation6 + $0x30] sm:$0xff]  ;;  %s420_s8 = scalar_lea.sflag [#allocation5], %s979_s16  ;;  %s741_s6 = scalar_lea.vmem %s435_s14, 128 }
  0x44   : > { %576 = vmatpush3.msra.mxu0 %v339_v3  ;;  %v330_v16 = vld [vmem:[#allocation6 + $0x28] sm:$0xff]  ;;  %v329_v17 = vld [vmem:[#allocation6 + $0x20] sm:$0xff]  ;;  %v328_v18 = vld [vmem:[#allocation6 + $0x18] sm:$0xff]  ;;  %p742_p1 = scmp.ne.s32.totalorder %s435_s14, %s741_s6  ;;  %s833_s21 = smov [#allocation8]  }
  0x45   : > { %577 = vmatprep.subr.mxu0 %v831_v2  ;;  %v327_v19 = vld [vmem:[#allocation6 + $0x10] sm:$0xff]  ;;  %v326_v20 = vld [vmem:[#allocation6 + $0x8] sm:$0xff]  ;;  %v325_v21 = vld [vmem:[#allocation6] sm:$0xff]  ;;  %s745_s9 = sshll.u32 %s833_s21, 4  ;;  %s746_s9 = int_to_ptr.vmem [resolvable:$false] %s745_s9 }
  0x46   : > { %578 = vmatpush3.msra.mxu0 %v338_v4  ;;  %v549_v26 = vld [vmem:[%s1051_s1] ss:$0 sm:$0xff]  ;;  %p743_p8 = pnand %p742_p1, %p951_p13  ;;  %s747_s25 = scalar_lea.vmem %s746_s9, 256 }
  0x47   : > { %579 = vmatprep.subr.mxu0 %v831_v2  ;;  %v550_v28 = vld [vmem:[%s1052_s2] ss:$0 sm:$0xff]  ;;  %p748_p0 = scmp.lt.s32.totalorder %s435_s14, %s746_s9  ;;  %p749_p2 = scmp.lt.s32.totalorder %s747_s25, %s741_s6 }
  0x48   : > { %580 = vmatpush3.msra.mxu0 %v337_v5  ;;  %v551_v31 = vld [vmem:[%s1054_s4] ss:$0 sm:$0xff]  ;;  %p744_p10 = pneg %p743_p8 }
  0x49   : > { %581 = vmatprep.subr.mxu0 %v831_v2  ;;  %p750_p3 = por %p749_p2, %p748_p0 }
  0x4a   : > { %582 = vmatpush3.msra.mxu0 %v336_v10 }
  0x4b   : > { %583 = vmatprep.subr.mxu0 %v831_v2  ;;  %p751_p5 = pnand %p750_p3, %p744_p10 }
  0x4c   : > { %584 = vmatpush3.msra.mxu0 %v335_v11 }
  0x4d   : > { %585 = vmatprep.subr.mxu0 %v831_v2 }
  0x4e   : > { %586 = vmatpush3.msra.mxu0 %v334_v12 }
  0x4f   : > { %587 = vmatprep.subr.mxu0 %v831_v2 }
  0x50   : > { %588 = vmatpush3.msra.mxu0 %v333_v13 }
  0x51   : > { %589 = vmatprep.subr.mxu0 %v831_v2 }
  0x52   : > { %590 = vmatpush3.msra.mxu0 %v332_v14 }
  0x53   : > { %591 = vmatprep.subr.mxu0 %v831_v2 }
  0x54   : > { %592 = vmatpush3.msra.mxu0 %v331_v15 }
  0x55   : > { %593 = vmatprep.subr.mxu0 %v831_v2 }
  0x56   : > { %594 = vmatpush3.msra.mxu0 %v330_v16 }
  0x57   : > { %595 = vmatprep.subr.mxu0 %v831_v2 }
  0x58   : > { %596 = vmatpush3.msra.mxu0 %v329_v17 }
  0x59   : > { %597 = vmatprep.subr.mxu0 %v831_v2 }
  0x5a   : > { %598 = vmatpush3.msra.mxu0 %v328_v18 }
  0x5b   : > { %599 = vmatprep.subr.mxu0 %v831_v2 }
  0x5c   : > { %600 = vmatpush3.msra.mxu0 %v327_v19 }
  0x5d   : > { %601 = vmatprep.subr.mxu0 %v831_v2 }
  0x5e   : > { %602 = vmatpush3.msra.mxu0 %v326_v20 }
  0x5f   : > { %603 = vmatprep.subr.mxu0 %v831_v2 }
  0x60   : > { %604 = vmatpush3.msra.mxu0 %v325_v21 }
  0xca   : > { %v296_v6 = vpop.xlane.xlu0 %295 }
  0xcb   : > { %v298_v7 = vmul.f32 0.0078125, %v296_v6 }
  0xcd   : > { %v299_v8 = vsub.f32 %v294_v0, %v298_v7 }
  0xcf   : > { %v300_v9 = vmul.f32 %v299_v8, %v299_v8 }
  0xd1   : > { %301 = vadd.xlane.f32.xlu0 %v300_v9 }
 0x15a   : > { %v302_v22 = vpop.xlane.xlu0 %301 }
 0x15b   : > { %v303_v23 = vmul.f32 0.0078125, %v302_v22 }
 0x15d   : > { %v304_v24 = vadd.f32 1e-05, %v303_v23 }
 0x15f   : > { %685 = vrsqrt.f32 %v304_v24 }
 0x16c   : > { %v686_v25 = vpop.eup %685 }
 0x16d   : > { %v306_v27 = vmul.f32 %v686_v25, %v299_v8 }
 0x16f   : > { %v314_v29 = vmul.f32 %v549_v26, %v306_v27 }
 0x171   : > { %v322_v30 = vadd.f32 %v550_v28, %v314_v29 }
 0x173   : > { %606 = vmatmul.mubr.f32.vlgmr.msra.gmra.mxu0 %v322_v30 }
 0x233   : > { %v414_v32 = vpop.f32.mrf.mxu0 }
 0x234   : > { %v415_v33 = vadd.f32 %v551_v31, %v414_v32 }
 0x235   : > { %v607_v34 = vpop.f32.mrf.mxu0 }
 0x236   : > { %418 = vst [vmem:[%s286_s13] sm:$0xff] %v415_v33 }
 0x237   : > { %754 = shalt.err (!%p751_p5)
}
 0x238   : > { %s755_s3 = scalar_lea.hbm %s1008_s15, 128  ;;  %s759_s28 = scalar_lea.hbm %s1055_s5, 256 }
 0x239   : > { %p756_p7 = scmp.ne.s32.totalorder %s1008_s15, %s755_s3  ;;  %p760_p9 = scmp.lt.s32.totalorder %s1008_s15, %s1055_s5 }
 0x23a   : > { %p761_p11 = scmp.lt.s32.totalorder %s759_s28, %s755_s3 }
 0x23b   : > { %p757_p6 = pnand %p756_p7, %p951_p13 }
 0x23c   : > { %p762_p12 = por %p761_p11, %p760_p9 }
 0x23d   : > { %p758_p4 = pneg %p757_p6 }
 0x23f   : > { %p763_p1 = pnand %p762_p12, %p758_p4 }
 0x241   : > { %766 = shalt.err (!%p763_p1)
}
 0x242   : > { %614 = dma.vmem_to_hbm [thread:$0]  (%p951_p13), %s435_s14, 128, %s1008_s15, %s420_s8  }
 0x243 PF: > { %s446_s11 = sand.u32 1, %s805_s18   ;;  %p1071_p8 = scmp.ne.s32.totalorder %s1062_s29, 0 }
 0x244   : > { %p1072_p10 = scmp.ge.s32.totalorder %s825_s23, 2  ;;  %s447_s12 = scalar_lea.sflag [#allocation5], %s446_s11 }
 0x246   : > { %p625_p0 = pnand %p1072_p10, %p1071_p8 }
 0x248   : > { %p626_p2 = pneg %p625_p0 }
 0x24a   : > { %800 = dma.done.wait (%p626_p2), %s447_s12, 128  }
 0x24b   : > { %802 = vsyncadd (%p626_p2), %s447_s12, 4294967168  ;;  %s22_s23 = sadd.s32 1, %s825_s23   ;;  %s1073_s17 = sld [smem:[#allocation12_spill]] }
 0x24c   : > { %p19_p3 = scmp.ge.s32.totalorder %s22_s23, 4   ;;  %s1074_s18 = smov %s809_s19 }
 0x24d   : > { %s1075_s19 = smov %s813_s20  ;;  %s1076_s20 = smov %s960_s7 }
 0x24e   : > { %s1077_s21 = smov %s821_s22  ;;  %21 = sbr.rel (!%p19_p3) target bundleno = 9 (0x9), region = 97 }
 0x251   : > { %s1078_s22 = smov %s1073_s17 }
 0x253   :  { %452 = vsyncpa [#allocation4], 1 }
 0x254   :  { %454 = vsyncpa [#allocation4 + $0x1], 1 }
 0x255   :  { %455 = vsyncpa [#allocation7], 1 }
 0x256   :  { %456 = vsyncpa [#allocation5], 1 }
 0x257   :  { %458 = vsyncpa [#allocation5 + $0x1], 1 }

</bundles_post_ra>
